<compile_context>
chip_gen: v6e
topology: v6e:2x2x1
jax: 0.10.0
libtpu: 0.0.40
codegen_flags: <defaults>
</compile_context>

<pallas_src>
import functools

import jax
import jax.numpy as jnp
from jax.experimental import pallas as pl
from jax.experimental.pallas import tpu as pltpu


# --------------------------------------------------------------------------- #
# Kernel 1a (Path 1): single-K-block matmul + masked BN partial stats
# --------------------------------------------------------------------------- #
def _conv_stats_single_kernel(p_ref, w_ref, conv_ref, stats_ref, *, m_total, tm):
    # p_ref:     (tm, K)    im2col patch tile (unpadded array, edge tile partial)
    # w_ref:     (K,  OCp)  full weight matrix (OC padded to 128)
    # conv_ref:  (tm, OCp)  f32 conv output tile
    # stats_ref: (8,  OCp)  row 0 = per-channel sum, row 1 = sum of squares
    conv = jnp.dot(p_ref[...], w_ref[...], preferred_element_type=jnp.float32)
    conv_ref[...] = conv

    # Mask rows beyond the true M (partial edge tile holds undefined data).
    i = pl.program_id(0)
    row = jax.lax.broadcasted_iota(jnp.int32, conv.shape, 0)
    valid = row < (m_total - i * tm)
    cm = jnp.where(valid, conv, 0.0)

    s = jnp.sum(cm, axis=0, keepdims=True)            # (1, OCp)
    sq = jnp.sum(cm * cm, axis=0, keepdims=True)       # (1, OCp)
    r = jax.lax.broadcasted_iota(jnp.int32, stats_ref.shape, 0)
    stats_ref[...] = jnp.where(r == 0, s, jnp.where(r == 1, sq, 0.0))


# --------------------------------------------------------------------------- #
# Kernel 1b (Path 2): K-tiled matmul with resident f32 accumulator + stats
# --------------------------------------------------------------------------- #
def _conv_stats_tiled_kernel(p_ref, w_ref, conv_ref, stats_ref):
    # p_ref:     (tm, tk)   zero-padded im2col patch tile
    # w_ref:     (tk, OCp)  weight tile
    # conv_ref:  (tm, OCp)  f32 accumulator (resident across the K axis)
    # stats_ref: (8,  OCp)  row 0 = sum, row 1 = sum of squares
    k = pl.program_id(1)

    @pl.when(k == 0)
    def _():
        conv_ref[...] = jnp.zeros_like(conv_ref)

    conv_ref[...] += jnp.dot(p_ref[...], w_ref[...],
                             preferred_element_type=jnp.float32)

    @pl.when(k == pl.num_programs(1) - 1)
    def _():
        conv = conv_ref[...]
        s = jnp.sum(conv, axis=0, keepdims=True)
        sq = jnp.sum(conv * conv, axis=0, keepdims=True)
        r = jax.lax.broadcasted_iota(jnp.int32, (8, conv.shape[1]), 0)
        stats_ref[...] = jnp.where(r == 0, s, jnp.where(r == 1, sq, 0.0))


# --------------------------------------------------------------------------- #
# Kernel 2: lane-dense fused BN-apply + ReLU (scale/shift precomputed)
# --------------------------------------------------------------------------- #
def _bn_relu_kernel(conv_ref, scale_ref, shift_ref, o_ref):
    y = conv_ref[...] * scale_ref[...] + shift_ref[...]
    o_ref[...] = jnp.maximum(y, 0.0).astype(o_ref.dtype)


# --------------------------------------------------------------------------- #
# Host-side glue
# --------------------------------------------------------------------------- #
def _round_up(x, m):
    return (x + m - 1) // m * m


def _im2col(x_nchw, kh, kw, stride, padding, dilation, out_dtype):
    N, C, H, W = x_nchw.shape
    xp = jnp.pad(x_nchw, ((0, 0), (0, 0), (padding, padding), (padding, padding)))
    OH = (H + 2 * padding - dilation * (kh - 1) - 1) // stride + 1
    OW = (W + 2 * padding - dilation * (kw - 1) - 1) // stride + 1
    cols = []
    for i in range(kh):
        for j in range(kw):
            hi = i * dilation
            wj = j * dilation
            cols.append(xp[:, :, hi:hi + stride * OH:stride,
                           wj:wj + stride * OW:stride])     # (N, C, OH, OW)
    # (N, C, KH*KW, OH, OW) -> (N, OH, OW, C, KH*KW) -> (M, K)
    cols = jnp.stack(cols, axis=2)
    patches = cols.transpose(0, 3, 4, 1, 2).reshape(N * OH * OW, C * kh * kw)
    return patches.astype(out_dtype), OH, OW


_VMEM_LIMIT = 32 * 1024 * 1024
_VMEM_BUDGET = 24 * 1024 * 1024   # leave headroom under the 32 MiB scoped limit


def _pick_single_block_tm(M, K, OCp, cdt_bytes):
    """Largest M-tile for the single-K-block path that fits the VMEM budget."""
    candidates = [min(512, _round_up(M, 8)), 256, 128, 64, 32, 16, 8]
    seen = set()
    for tm in candidates:
        if tm in seen or tm > max(8, _round_up(M, 8)) or tm % 8 != 0:
            continue
        seen.add(tm)
        est = (2 * tm * K * cdt_bytes          # patches, double-buffered
               + 2 * K * OCp * cdt_bytes       # weights, double-buffered
               + 2 * tm * OCp * 4              # f32 conv output
               + 2 * 8 * OCp * 4)              # stats
        if est <= _VMEM_BUDGET:
            return tm
    return None


def basic_conv2d(x_nchw, weight, gamma, beta, *, stride=1, padding=0,
                 dilation=1, groups=1, eps=1e-5, compute_dtype=None):
    """Conv2d(bias=False) + BatchNorm2d(training batch stats) + ReLU."""
    assert groups == 1, "grouped conv not supported"
    N, C, H, W = x_nchw.shape
    OC, _, KH, KW = weight.shape

    cdt = compute_dtype if compute_dtype is not None else x_nchw.dtype
    cdt_bytes = jnp.dtype(cdt).itemsize

    patches, OH, OW = _im2col(x_nchw, KH, KW, stride, padding, dilation, cdt)
    M, K = patches.shape
    w_mat = weight.reshape(OC, K).T                                    # (K, OC)

    OCp = _round_up(OC, 128)
    tm1 = _pick_single_block_tm(M, K, OCp, cdt_bytes)

    if tm1 is not None:
        # ------------- Path 1: single K block, no patch padding copy -------- #
        n_m = pl.cdiv(M, tm1)
        w_p = jnp.zeros((K, OCp), cdt).at[:, :OC].set(w_mat.astype(cdt))

        cost1 = pl.CostEstimate(
            flops=2 * M * K * OCp,
            transcendentals=0,
            bytes_accessed=(M * K * cdt_bytes + K * OCp * cdt_bytes
                            + M * OCp * 4 + n_m * 8 * OCp * 4),
        )

        conv_f32, stats = pl.pallas_call(
            functools.partial(_conv_stats_single_kernel, m_total=M, tm=tm1),
            out_shape=(jax.ShapeDtypeStruct((M, OCp), jnp.float32),
                       jax.ShapeDtypeStruct((n_m * 8, OCp), jnp.float32)),
            grid=(n_m,),
            in_specs=[
                pl.BlockSpec((tm1, K), lambda i: (i, 0)),
                pl.BlockSpec((K, OCp), lambda i: (0, 0)),
            ],
            out_specs=(pl.BlockSpec((tm1, OCp), lambda i: (i, 0)),
                       pl.BlockSpec((8, OCp), lambda i: (i, 0))),
            compiler_params=pltpu.CompilerParams(
                dimension_semantics=("parallel",),
                vmem_limit_bytes=_VMEM_LIMIT),
            cost_estimate=cost1,
        )(patches, w_p)
        M_conv = M
    else:
        # ------------- Path 2: K-tiled matmul over zero-padded patches ------ #
        Kp = _round_up(K, 128)
        tk = 512 if Kp % 512 == 0 else (256 if Kp % 256 == 0 else 128)
        tm = min(256, _round_up(M, 8))
        Mp = _round_up(M, tm)
        n_m, n_k = Mp // tm, Kp // tk

        patches_p = jnp.zeros((Mp, Kp), cdt).at[:M, :K].set(patches)
        w_p = jnp.zeros((Kp, OCp), cdt).at[:K, :OC].set(w_mat.astype(cdt))

        cost1 = pl.CostEstimate(
            flops=2 * Mp * Kp * OCp,
            transcendentals=0,
            bytes_accessed=(Mp * Kp * cdt_bytes + Kp * OCp * cdt_bytes
                            + Mp * OCp * 4 + n_m * 8 * OCp * 4),
        )

        conv_f32, stats = pl.pallas_call(
            _conv_stats_tiled_kernel,
            out_shape=(jax.ShapeDtypeStruct((Mp, OCp), jnp.float32),
                       jax.ShapeDtypeStruct((n_m * 8, OCp), jnp.float32)),
            grid=(n_m, n_k),
            in_specs=[
                pl.BlockSpec((tm, tk), lambda i, k: (i, k)),
                pl.BlockSpec((tk, OCp), lambda i, k: (k, 0)),
            ],
            out_specs=(pl.BlockSpec((tm, OCp), lambda i, k: (i, 0)),
                       pl.BlockSpec((8, OCp), lambda i, k: (i, 0))),
            compiler_params=pltpu.CompilerParams(
                dimension_semantics=("parallel", "arbitrary"),
                vmem_limit_bytes=_VMEM_LIMIT),
            cost_estimate=cost1,
        )(patches_p, w_p)
        M_conv = Mp

    # ---- tiny cross-tile reduction + fold gamma/beta/eps into scale/shift -- #
    stats = stats.reshape(-1, 8, OCp)
    ch_sum = stats[:, 0, :].sum(axis=0)                       # (OCp,)
    ch_sumsq = stats[:, 1, :].sum(axis=0)                     # (OCp,)
    m_count = jnp.float32(M)
    mean = ch_sum / m_count
    var = jnp.maximum(ch_sumsq / m_count - mean * mean, 0.0)  # biased var (train mode)
    inv_std = jax.lax.rsqrt(var + eps)

    gamma_p = jnp.ones((OCp,), jnp.float32).at[:OC].set(gamma.astype(jnp.float32))
    beta_p = jnp.zeros((OCp,), jnp.float32).at[:OC].set(beta.astype(jnp.float32))
    scale = (gamma_p * inv_std).reshape(1, OCp)
    shift = (beta_p - mean * gamma_p * inv_std).reshape(1, OCp)

    # ---- kernel 2: normalize + ReLU (elementwise, fully parallel) ---------- #
    tm2 = min(2048, _round_up(M_conv, 8))
    n_m2 = pl.cdiv(M_conv, tm2)
    out_bytes = jnp.dtype(x_nchw.dtype).itemsize
    cost2 = pl.CostEstimate(
        flops=2 * M_conv * OCp,
        transcendentals=0,
        bytes_accessed=M_conv * OCp * (4 + out_bytes) + 2 * OCp * 4,
    )

    out_flat = pl.pallas_call(
        _bn_relu_kernel,
        out_shape=jax.ShapeDtypeStruct((M_conv, OCp), x_nchw.dtype),
        grid=(n_m2,),
        in_specs=[
            pl.BlockSpec((tm2, OCp), lambda i: (i, 0)),
            pl.BlockSpec((1, OCp), lambda i: (0, 0)),
            pl.BlockSpec((1, OCp), lambda i: (0, 0)),
        ],
        out_specs=pl.BlockSpec((tm2, OCp), lambda i: (i, 0)),
        compiler_params=pltpu.CompilerParams(
            dimension_semantics=("parallel",),
            vmem_limit_bytes=_VMEM_LIMIT),
        cost_estimate=cost2,
    )(conv_f32, scale, shift)

    # slice real rows/channels -> (N, OH, OW, OC) -> NCHW
    return out_flat[:M, :OC].reshape(N, OH, OW, OC).transpose(0, 3, 1, 2)


# --------------------------------------------------------------------------- #
# Pure-JAX reference (correctness check)
# --------------------------------------------------------------------------- #
def basic_conv2d_ref(x, weight, gamma, beta, *, stride=1, padding=0,
                     dilation=1, eps=1e-5):
    conv = jax.lax.conv_general_dilated(
        x, weight,
        window_strides=(stride, stride),
        padding=[(padding, padding), (padding, padding)],
        rhs_dilation=(dilation, dilation),
        dimension_numbers=("NCHW", "OIHW", "NCHW"),
    )
    mean = conv.mean(axis=(0, 2, 3), keepdims=True)
    var = ((conv - mean) ** 2).mean(axis=(0, 2, 3), keepdims=True)
    y = (conv - mean) * jax.lax.rsqrt(var + eps)
    y = y * gamma.reshape(1, -1, 1, 1) + beta.reshape(1, -1, 1, 1)
    return jnp.maximum(y, 0.0)


# --------------------------------------------------------------------------- #
if __name__ == "__main__":
    key = jax.random.PRNGKey(0)
    k_x, k_w, k_g, k_b = jax.random.split(key, 4)

    # BasicConv2d(in_planes=4, out_planes=8, kernel_size=3, stride=1, padding=1)
    N, C, H, W = 2, 4, 16, 16
    OC, KH, KW = 8, 3, 3
    stride, padding, dilation = 1, 1, 1

    x = jax.random.normal(k_x, (N, C, H, W), dtype=jnp.float32)
    weight = jax.random.normal(k_w, (OC, C, KH, KW), dtype=jnp.float32) * 0.1
    gamma = jax.random.normal(k_g, (OC,), dtype=jnp.float32) * 0.1 + 1.0
    beta = jax.random.normal(k_b, (OC,), dtype=jnp.float32) * 0.1

    out = basic_conv2d(x, weight, gamma, beta,
                       stride=stride, padding=padding, dilation=dilation)
    out = jax.block_until_ready(out)

    ref = basic_conv2d_ref(x, weight, gamma, beta,
                           stride=stride, padding=padding, dilation=dilation)
    assert out.shape == (N, OC, H, W), out.shape
    assert jnp.allclose(out, ref, atol=1e-3, rtol=1e-3), "mismatch vs reference"

    print("KERNEL_OK")
</pallas_src>

<mosaic_0001>
module attributes {stable_mosaic.version = 11 : i64} {
  func.func @_conv_stats_single_kernel(%arg0: i32, %arg1: memref<512x36xf32, #tpu.memory_space<vmem>>, %arg2: memref<36x128xf32, #tpu.memory_space<vmem>>, %arg3: memref<512x128xf32, #tpu.memory_space<vmem>>, %arg4: memref<8x128xf32, #tpu.memory_space<vmem>>) attributes {dimension_semantics = [#tpu.dimension_semantics<parallel>], iteration_bounds = array<i64: 1>, scalar_prefetch = 0 : i64, scratch_operands = 0 : i64, tpu.core_type = #tpu.core_type<tc>, window_params = [{transform_indices = @transform_0, window_bounds = array<i64: 512, 36>}, {pipeline_mode = #tpu.pipeline_mode<synchronous>, transform_indices = @transform_1, window_bounds = array<i64: 36, 128>}, {transform_indices = @transform_2, window_bounds = array<i64: 512, 128>}, {transform_indices = @transform_3, window_bounds = array<i64: 8, 128>}]} {
    %c0 = arith.constant 0 : index
    %c0_0 = arith.constant 0 : index
    %0 = vector.load %arg1[%c0, %c0_0] : memref<512x36xf32, #tpu.memory_space<vmem>>, vector<512x36xf32>
    %c0_1 = arith.constant 0 : index
    %c0_2 = arith.constant 0 : index
    %1 = vector.load %arg2[%c0_1, %c0_2] : memref<36x128xf32, #tpu.memory_space<vmem>>, vector<36x128xf32>
    %cst = arith.constant dense<0.000000e+00> : vector<512x128xf32>
    %2 = tpu.matmul %0, %1, %cst {dimension_numbers = #tpu.dot_dimension_numbers<[1], [0], [0], [1], [0, 0, 1, 1], [], []>} : vector<512x36xf32>, vector<36x128xf32>, vector<512x128xf32> -> vector<512x128xf32>
    %c0_3 = arith.constant 0 : index
    %c0_4 = arith.constant 0 : index
    %3 = vector.load %arg3[%c0_3, %c0_4] : memref<512x128xf32, #tpu.memory_space<vmem>>, vector<512x128xf32>
    tpu.vector_store %arg3[%c0_3, %c0_4], %2 {strides = array<i32>} : memref<512x128xf32, #tpu.memory_space<vmem>>, vector<512x128xf32>,
    %4 = tpu.iota {dimensions = array<i32: 0>} : vector<512x128xi32>
    %c512_i32 = arith.constant 512 : i32
    %5 = arith.muli %arg0, %c512_i32 : i32
    %c512_i32_5 = arith.constant 512 : i32
    %6 = arith.subi %c512_i32_5, %5 : i32
    %7 = vector.broadcast %6 : i32 to vector<512x128xi32>
    %8 = arith.cmpi slt, %4, %7 : vector<512x128xi32>
    %cst_6 = arith.constant 0.000000e+00 : f32
    %9 = vector.broadcast %cst_6 : f32 to vector<512x128xf32>
    %10 = arith.select %8, %2, %9 : vector<512x128xi1>, vector<512x128xf32>
    %cst_7 = arith.constant dense<0.000000e+00> : vector<128xf32>
    %11 = vector.multi_reduction <add>, %10, %cst_7 [0] : vector<512x128xf32> to vector<128xf32>
    %12 = vector.shape_cast %11 : vector<128xf32> to vector<1x128xf32>
    %13 = arith.mulf %10, %10 : vector<512x128xf32>
    %cst_8 = arith.constant dense<0.000000e+00> : vector<128xf32>
    %14 = vector.multi_reduction <add>, %13, %cst_8 [0] : vector<512x128xf32> to vector<128xf32>
    %15 = vector.shape_cast %14 : vector<128xf32> to vector<1x128xf32>
    %16 = tpu.iota {dimensions = array<i32: 0>} : vector<8x128xi32>
    %c0_i32 = arith.constant 0 : i32
    %17 = vector.broadcast %c0_i32 : i32 to vector<8x128xi32>
    %18 = arith.cmpi eq, %16, %17 : vector<8x128xi32>
    %c1_i32 = arith.constant 1 : i32
    %19 = vector.broadcast %c1_i32 : i32 to vector<8x128xi32>
    %20 = arith.cmpi eq, %16, %19 : vector<8x128xi32>
    %cst_9 = arith.constant 0.000000e+00 : f32
    %21 = vector.shape_cast %15 : vector<1x128xf32> to vector<1x128xf32>
    %22 = vector.broadcast %21 : vector<1x128xf32> to vector<8x128xf32>
    %23 = vector.broadcast %cst_9 : f32 to vector<8x128xf32>
    %24 = arith.select %20, %22, %23 : vector<8x128xi1>, vector<8x128xf32>
    %25 = vector.shape_cast %12 : vector<1x128xf32> to vector<1x128xf32>
    %26 = vector.broadcast %25 : vector<1x128xf32> to vector<8x128xf32>
    %27 = arith.select %18, %26, %24 : vector<8x128xi1>, vector<8x128xf32>
    %c0_10 = arith.constant 0 : index
    %c0_11 = arith.constant 0 : index
    %28 = vector.load %arg4[%c0_10, %c0_11] : memref<8x128xf32, #tpu.memory_space<vmem>>, vector<8x128xf32>
    tpu.vector_store %arg4[%c0_10, %c0_11], %27 {strides = array<i32>} : memref<8x128xf32, #tpu.memory_space<vmem>>, vector<8x128xf32>,
    return
  }
  func.func @transform_0(%arg0: i32) -> (i32, i32) {
    %c0_i32 = arith.constant 0 : i32
    %c0_i32_0 = arith.constant 0 : i32
    return %arg0, %c0_i32 : i32, i32
  }
  func.func @transform_1(%arg0: i32) -> (i32, i32) {
    %c0_i32 = arith.constant 0 : i32
    %c0_i32_0 = arith.constant 0 : i32
    %c0_i32_1 = arith.constant 0 : i32
    return %c0_i32, %c0_i32_0 : i32, i32
  }
  func.func @transform_2(%arg0: i32) -> (i32, i32) {
    %c0_i32 = arith.constant 0 : i32
    %c0_i32_0 = arith.constant 0 : i32
    return %arg0, %c0_i32 : i32, i32
  }
  func.func @transform_3(%arg0: i32) -> (i32, i32) {
    %c0_i32 = arith.constant 0 : i32
    %c0_i32_0 = arith.constant 0 : i32
    return %arg0, %c0_i32 : i32, i32
  }
}

</mosaic_0001>

<bundles_post_ra>
// kernel: tpu_custom_call.1
= control target key start
LH: loop header
LB: loop body
LE: loop exit
PB: predicated region body
PF: predicated region fallthrough
CT: control target
= control target key end

     0   :  { %9 = vsyncpa [#allocation3], 0  ;;  %vm277_vm0 = vcmask 1043456   ;;  %vm84_vm1 = vcmask 293888   ;;  %s1954_s0 = inlined_call_operand.vmem [shape: f32[512,36], index: 0, kind: input, shape index: {}]   ;;  %s1955_s1 = inlined_call_operand.vmem [shape: f32[36,128], index: 1, kind: input, shape index: {}]   ;;  %s1956_s2 = inlined_call_operand.hbm [shape: f32[512,128], index: 2, kind: output, shape index: {0}]   ;;  %s1957_s3 = inlined_call_operand.hbm [shape: f32[8,128], index: 3, kind: output, shape index: {1}]  }
   0x1   :  { %v83_v0 = vld [vmem:[%s1955_s1 + $0x20] sm:$0xf]  ;;  %v82_v1 = vld [vmem:[%s1955_s1 + $0x18] sm:$0xff]  ;;  %v81_v3 = vld [vmem:[%s1955_s1 + $0x10] sm:$0xff] }
   0x2   :  { %1297 = vmatprep.subr.msk.mxu0 %vm277_vm0, %v83_v0  ;;  %v15_v2 = vld [vmem:[%s1954_s0] sm:$0xff]  ;;  %1403 = vmatprep.subr.msk.mxu1 %vm277_vm0, %v83_v0  ;;  %v80_v4 = vld [vmem:[%s1955_s1 + $0x8] sm:$0xff]  ;;  %v17_v7 = vld [vmem:[%s1954_s0 + $0x10] sm:$0xff] }
   0x3   :  { %1298 = vmatpush3.msk.msra.mxu0 %vm277_vm0, %v83_v0  ;;  %1307 = vmatprep.mubr.msk.f32.mxu0 %vm84_vm1, %v15_v2  ;;  %v79_v5 = vld [vmem:[%s1955_s1] sm:$0xff]  ;;  %v16_v6 = vld [vmem:[%s1954_s0 + $0x8] sm:$0xff]  ;;  %v18_v8 = vld [vmem:[%s1954_s0 + $0x18] sm:$0xff] }
   0x4   :  { %1299 = vmatprep.subr.mxu0 %v82_v1  ;;  %1408 = vmatpush3.msk.msra.mxu1 %vm277_vm0, %v83_v0  ;;  %v47_v9 = vld [vmem:[%s1954_s0 + $0x100] sm:$0xff]  ;;  %v48_v10 = vld [vmem:[%s1954_s0 + $0x108] sm:$0xff]  ;;  %v49_v12 = vld [vmem:[%s1954_s0 + $0x110] sm:$0xff] }
   0x5   :  { %1300 = vmatpush3.msra.mxu0 %v82_v1  ;;  %1404 = vmatprep.subr.mxu1 %v82_v1  ;;  %v19_v11 = vld [vmem:[%s1954_s0 + $0x20] sm:$0xff]  ;;  %v50_v13 = vld [vmem:[%s1954_s0 + $0x118] sm:$0xff]  ;;  %v20_v14 = vld [vmem:[%s1954_s0 + $0x28] sm:$0xff] }
   0x6   :  { %1301 = vmatprep.subr.mxu0 %v81_v3  ;;  %1409 = vmatpush3.msra.mxu1 %v82_v1  ;;  %v51_v15 = vld [vmem:[%s1954_s0 + $0x120] sm:$0xff]  ;;  %v21_v16 = vld [vmem:[%s1954_s0 + $0x30] sm:$0xff]  ;;  %v52_v17 = vld [vmem:[%s1954_s0 + $0x128] sm:$0xff] }
   0x7   :  { %1302 = vmatpush3.msra.mxu0 %v81_v3  ;;  %1405 = vmatprep.subr.mxu1 %v81_v3  ;;  %v22_v18 = vld [vmem:[%s1954_s0 + $0x38] sm:$0xff]  ;;  %v53_v19 = vld [vmem:[%s1954_s0 + $0x130] sm:$0xff]  ;;  %v23_v20 = vld [vmem:[%s1954_s0 + $0x40] sm:$0xff] }
   0x8   :  { %1303 = vmatprep.subr.mxu0 %v80_v4  ;;  %1410 = vmatpush3.msra.mxu1 %v81_v3  ;;  %v54_v21 = vld [vmem:[%s1954_s0 + $0x138] sm:$0xff] }
   0x9   :  { %1304 = vmatpush3.msra.mxu0 %v80_v4  ;;  %1406 = vmatprep.subr.mxu1 %v80_v4 }
   0xa   :  { %1305 = vmatprep.subr.mxu0 %v79_v5  ;;  %1411 = vmatpush3.msra.mxu1 %v80_v4 }
   0xb   :  { %1306 = vmatpush3.msra.mxu0 %v79_v5  ;;  %1407 = vmatprep.subr.mxu1 %v79_v5 }
   0xc   :  { %1308 = vmatmul.mubr.msk.f32.vlgmr.msra.gmra.mxu0 %vm84_vm1, %v16_v6  ;;  %1412 = vmatpush3.msra.mxu1 %v79_v5 }
   0xd   :  { %1310 = vmatprep.mubr.msk.f32.mxu0 %vm84_vm1, %v17_v7  ;;  %1355 = vmatprep.mubr.msk.f32.mxu1 %vm84_vm1, %v47_v9 }
   0xe   :  { %1356 = vmatmul.mubr.msk.f32.vlgmr.msra.gmra.mxu1 %vm84_vm1, %v48_v10 }
   0xf   :  { %1358 = vmatprep.mubr.msk.f32.mxu1 %vm84_vm1, %v49_v12 }
  0x10   :  { %1311 = vmatmul.mubr.msk.f32.gmra.mxu0 %vm84_vm1, %v18_v8 }
  0x11   :  { %1313 = vmatprep.mubr.msk.f32.mxu0 %vm84_vm1, %v19_v11 }
  0x12   :  { %1359 = vmatmul.mubr.msk.f32.gmra.mxu1 %vm84_vm1, %v50_v13 }
  0x13   :  { %1361 = vmatprep.mubr.msk.f32.mxu1 %vm84_vm1, %v51_v15 }
  0x14   :  { %1314 = vmatmul.mubr.msk.f32.gmra.mxu0 %vm84_vm1, %v20_v14 }
  0x15   :  { %1316 = vmatprep.mubr.msk.f32.mxu0 %vm84_vm1, %v21_v16 }
  0x16   :  { %1362 = vmatmul.mubr.msk.f32.gmra.mxu1 %vm84_vm1, %v52_v17 }
  0x17   :  { %1364 = vmatprep.mubr.msk.f32.mxu1 %vm84_vm1, %v53_v19 }
  0x18   :  { %1317 = vmatmul.mubr.msk.f32.gmra.mxu0 %vm84_vm1, %v22_v18 }
  0x19   :  { %10 = vsyncpa [#allocation5], 0  ;;  %1319 = vmatprep.mubr.msk.f32.mxu0 %vm84_vm1, %v23_v20  ;;  %v24_v22 = vld [vmem:[%s1954_s0 + $0x48] sm:$0xff]  ;;  %v55_v23 = vld [vmem:[%s1954_s0 + $0x140] sm:$0xff] }
  0x1a   :  { %v25_v24 = vld [vmem:[%s1954_s0 + $0x50] sm:$0xff]  ;;  %1365 = vmatmul.mubr.msk.f32.gmra.mxu1 %vm84_vm1, %v54_v21  ;;  %v56_v25 = vld [vmem:[%s1954_s0 + $0x148] sm:$0xff]  ;;  %v26_v26 = vld [vmem:[%s1954_s0 + $0x58] sm:$0xff] }
  0x1b   :  { %1367 = vmatprep.mubr.msk.f32.mxu1 %vm84_vm1, %v55_v23  ;;  %v57_v27 = vld [vmem:[%s1954_s0 + $0x150] sm:$0xff]  ;;  %v27_v28 = vld [vmem:[%s1954_s0 + $0x60] sm:$0xff]  ;;  %v58_v29 = vld [vmem:[%s1954_s0 + $0x158] sm:$0xff] }
  0x1c   :  { %1320 = vmatmul.mubr.msk.f32.gmra.mxu0 %vm84_vm1, %v24_v22  ;;  %v28_v30 = vld [vmem:[%s1954_s0 + $0x68] sm:$0xff]  ;;  %v59_v31 = vld [vmem:[%s1954_s0 + $0x160] sm:$0xff]  ;;  %v29_v32 = vld [vmem:[%s1954_s0 + $0x70] sm:$0xff] }
  0x1d   :  { %1322 = vmatprep.mubr.msk.f32.mxu0 %vm84_vm1, %v25_v24  ;;  %v60_v33 = vld [vmem:[%s1954_s0 + $0x168] sm:$0xff]  ;;  %v30_v34 = vld [vmem:[%s1954_s0 + $0x78] sm:$0xff]  ;;  %v61_v35 = vld [vmem:[%s1954_s0 + $0x170] sm:$0xff] }
  0x1e   :  { %1368 = vmatmul.mubr.msk.f32.gmra.mxu1 %vm84_vm1, %v56_v25  ;;  %v31_v36 = vld [vmem:[%s1954_s0 + $0x80] sm:$0xff]  ;;  %v62_v37 = vld [vmem:[%s1954_s0 + $0x178] sm:$0xff]  ;;  %v32_v38 = vld [vmem:[%s1954_s0 + $0x88] sm:$0xff] }
  0x1f   :  { %1370 = vmatprep.mubr.msk.f32.mxu1 %vm84_vm1, %v57_v27  ;;  %v63_v39 = vld [vmem:[%s1954_s0 + $0x180] sm:$0xff]  ;;  %v33_v40 = vld [vmem:[%s1954_s0 + $0x90] sm:$0xff]  ;;  %v64_v41 = vld [vmem:[%s1954_s0 + $0x188] sm:$0xff] }
  0x20   :  { %1323 = vmatmul.mubr.msk.f32.gmra.mxu0 %vm84_vm1, %v26_v26  ;;  %v34_v42 = vld [vmem:[%s1954_s0 + $0x98] sm:$0xff]  ;;  %v65_v43 = vld [vmem:[%s1954_s0 + $0x190] sm:$0xff]  ;;  %v35_v44 = vld [vmem:[%s1954_s0 + $0xa0] sm:$0xff] }
  0x21   :  { %1325 = vmatprep.mubr.msk.f32.mxu0 %vm84_vm1, %v27_v28  ;;  %v66_v45 = vld [vmem:[%s1954_s0 + $0x198] sm:$0xff]  ;;  %v36_v46 = vld [vmem:[%s1954_s0 + $0xa8] sm:$0xff]  ;;  %v67_v47 = vld [vmem:[%s1954_s0 + $0x1a0] sm:$0xff] }
  0x22   :  { %1371 = vmatmul.mubr.msk.f32.gmra.mxu1 %vm84_vm1, %v58_v29  ;;  %v37_v48 = vld [vmem:[%s1954_s0 + $0xb0] sm:$0xff]  ;;  %v68_v49 = vld [vmem:[%s1954_s0 + $0x1a8] sm:$0xff]  ;;  %v38_v50 = vld [vmem:[%s1954_s0 + $0xb8] sm:$0xff] }
  0x23   :  { %1373 = vmatprep.mubr.msk.f32.mxu1 %vm84_vm1, %v59_v31  ;;  %v69_v51 = vld [vmem:[%s1954_s0 + $0x1b0] sm:$0xff]  ;;  %v39_v52 = vld [vmem:[%s1954_s0 + $0xc0] sm:$0xff]  ;;  %v70_v53 = vld [vmem:[%s1954_s0 + $0x1b8] sm:$0xff] }
  0x24   :  { %1326 = vmatmul.mubr.msk.f32.gmra.mxu0 %vm84_vm1, %v28_v30  ;;  %v40_v54 = vld [vmem:[%s1954_s0 + $0xc8] sm:$0xff]  ;;  %v71_v55 = vld [vmem:[%s1954_s0 + $0x1c0] sm:$0xff]  ;;  %v41_v56 = vld [vmem:[%s1954_s0 + $0xd0] sm:$0xff] }
  0x25   :  { %1328 = vmatprep.mubr.msk.f32.mxu0 %vm84_vm1, %v29_v32  ;;  %v72_v57 = vld [vmem:[%s1954_s0 + $0x1c8] sm:$0xff]  ;;  %v42_v58 = vld [vmem:[%s1954_s0 + $0xd8] sm:$0xff]  ;;  %v73_v59 = vld [vmem:[%s1954_s0 + $0x1d0] sm:$0xff] }
  0x26   :  { %1374 = vmatmul.mubr.msk.f32.gmra.mxu1 %vm84_vm1, %v60_v33  ;;  %v43_v60 = vld [vmem:[%s1954_s0 + $0xe0] sm:$0xff]  ;;  %v74_v61 = vld [vmem:[%s1954_s0 + $0x1d8] sm:$0xff]  ;;  %v44_v62 = vld [vmem:[%s1954_s0 + $0xe8] sm:$0xff] }
  0x27   :  { %1376 = vmatprep.mubr.msk.f32.mxu1 %vm84_vm1, %v61_v35  ;;  %v75_v63 = vld [vmem:[%s1954_s0 + $0x1e0] sm:$0xff]  ;;  %v45_v0 = vld [vmem:[%s1954_s0 + $0xf0] sm:$0xff]  ;;  %v76_v1 = vld [vmem:[%s1954_s0 + $0x1e8] sm:$0xff] }
  0x28   :  { %1329 = vmatmul.mubr.msk.f32.gmra.mxu0 %vm84_vm1, %v30_v34  ;;  %v46_v2 = vld [vmem:[%s1954_s0 + $0xf8] sm:$0xff]  ;;  %v77_v3 = vld [vmem:[%s1954_s0 + $0x1f0] sm:$0xff] }
  0x29   :  { %1331 = vmatprep.mubr.msk.f32.mxu0 %vm84_vm1, %v31_v36  ;;  %v78_v4 = vld [vmem:[%s1954_s0 + $0x1f8] sm:$0xff]  ;;  %s1461_s0 = smov [#allocation2]  }
  0x2a   :  { %1377 = vmatmul.mubr.msk.f32.gmra.mxu1 %vm84_vm1, %v62_v37  ;;  %s1138_s10 = sshll.u32 %s1461_s0, 4  ;;  %s1139_s10 = int_to_ptr.vmem [resolvable:$true] %s1138_s10 }
  0x2b   :  { %1379 = vmatprep.mubr.msk.f32.mxu1 %vm84_vm1, %v63_v39  ;;  %s1417_s11 = scalar_lea.vmem %s1139_s10, 8192  ;;  %p1422_p1 = scmp.lt.s32.totalorder %s1139_s10, %s1139_s10 }
  0x2c   :  { %1332 = vmatmul.mubr.msk.f32.gmra.mxu0 %vm84_vm1, %v32_v38  ;;  %p1418_p0 = scmp.ne.s32.totalorder %s1139_s10, %s1417_s11  ;;  %p1423_p2 = scmp.lt.s32.totalorder %s1417_s11, %s1417_s11 }
  0x2d   :  { %1334 = vmatprep.mubr.msk.f32.mxu0 %vm84_vm1, %v33_v40 }
  0x2e   :  { %1380 = vmatmul.mubr.msk.f32.gmra.mxu1 %vm84_vm1, %v64_v41  ;;  %p1424_p3 = por %p1423_p2, %p1422_p1 }
  0x2f   :  { %1382 = vmatprep.mubr.msk.f32.mxu1 %vm84_vm1, %v65_v43 }
  0x30   :  { %1335 = vmatmul.mubr.msk.f32.gmra.mxu0 %vm84_vm1, %v34_v42  ;;  %p1425_p4 = pnand %p1424_p3, %p1418_p0 }
  0x31   :  { %1337 = vmatprep.mubr.msk.f32.mxu0 %vm84_vm1, %v35_v44 }
  0x32   :  { %1383 = vmatmul.mubr.msk.f32.gmra.mxu1 %vm84_vm1, %v66_v45 }
  0x33   :  { %1385 = vmatprep.mubr.msk.f32.mxu1 %vm84_vm1, %v67_v47 }
  0x34   :  { %1338 = vmatmul.mubr.msk.f32.gmra.mxu0 %vm84_vm1, %v36_v46 }
  0x35   :  { %1340 = vmatprep.mubr.msk.f32.mxu0 %vm84_vm1, %v37_v48 }
  0x36   :  { %1386 = vmatmul.mubr.msk.f32.gmra.mxu1 %vm84_vm1, %v68_v49 }
  0x37   :  { %1388 = vmatprep.mubr.msk.f32.mxu1 %vm84_vm1, %v69_v51 }
  0x38   :  { %1341 = vmatmul.mubr.msk.f32.gmra.mxu0 %vm84_vm1, %v38_v50 }
  0x39   :  { %1343 = vmatprep.mubr.msk.f32.mxu0 %vm84_vm1, %v39_v52 }
  0x3a   :  { %1389 = vmatmul.mubr.msk.f32.gmra.mxu1 %vm84_vm1, %v70_v53 }
  0x3b   :  { %1391 = vmatprep.mubr.msk.f32.mxu1 %vm84_vm1, %v71_v55 }
  0x3c   :  { %1344 = vmatmul.mubr.msk.f32.gmra.mxu0 %vm84_vm1, %v40_v54 }
  0x3d   :  { %1346 = vmatprep.mubr.msk.f32.mxu0 %vm84_vm1, %v41_v56 }
  0x3e   :  { %1392 = vmatmul.mubr.msk.f32.gmra.mxu1 %vm84_vm1, %v72_v57 }
  0x3f   :  { %1394 = vmatprep.mubr.msk.f32.mxu1 %vm84_vm1, %v73_v59 }
  0x40   :  { %1347 = vmatmul.mubr.msk.f32.gmra.mxu0 %vm84_vm1, %v42_v58 }
  0x41   :  { %1349 = vmatprep.mubr.msk.f32.mxu0 %vm84_vm1, %v43_v60 }
  0x42   :  { %1395 = vmatmul.mubr.msk.f32.gmra.mxu1 %vm84_vm1, %v74_v61 }
  0x43   :  { %1397 = vmatprep.mubr.msk.f32.mxu1 %vm84_vm1, %v75_v63 }
  0x44   :  { %1350 = vmatmul.mubr.msk.f32.gmra.mxu0 %vm84_vm1, %v44_v62 }
  0x45   :  { %1352 = vmatprep.mubr.msk.f32.mxu0 %vm84_vm1, %v45_v0 }
  0x46   :  { %1398 = vmatmul.mubr.msk.f32.gmra.mxu1 %vm84_vm1, %v76_v1 }
  0x47   :  { %1400 = vmatprep.mubr.msk.f32.mxu1 %vm84_vm1, %v77_v3 }
  0x48   :  { %1353 = vmatmul.mubr.msk.f32.gmra.mxu0 %vm84_vm1, %v46_v2 }
  0x4a   :  { %1401 = vmatmul.mubr.msk.f32.gmra.mxu1 %vm84_vm1, %v78_v4 }
  0xcc   :  { %v1309_v5 = vpop.f32.mrf.mxu0 }
  0xcd   :  { %667 = vst [vmem:[#allocation2 + $0x8] sm:$0xff] %v1309_v5  ;;  %v996_v10 = vmul.f32 %v1309_v5, %v1309_v5 }
  0xce   :  { %v347_v6 = vpop.f32.mrf.mxu0  ;;  %v1756_v8 = vpop.f32.mrf.mxu1 }
  0xcf   :  { %666 = vst [vmem:[#allocation2] sm:$0xff] %v347_v6  ;;  %v995_v7 = vmul.f32 %v347_v6, %v347_v6  ;;  %699 = vst [vmem:[#allocation2 + $0x108] sm:$0xff] %v1756_v8  ;;  %v926_v11 = vadd.f32 %v1309_v5, %v347_v6 }
  0xd0   :  { %v1312_v9 = vpop.f32.mrf.mxu0  ;;  %v1759_v12 = vpop.f32.mrf.mxu1 }
  0xd1   :  { %669 = vst [vmem:[#allocation2 + $0x18] sm:$0xff] %v1312_v9  ;;  %698 = vst [vmem:[#allocation2 + $0x100] sm:$0xff] %v1759_v12  ;;  %v1059_v14 = vadd.f32 %v996_v10, %v995_v7  ;;  %v998_v19 = vmul.f32 %v1312_v9, %v1312_v9 }
  0xd2   :  { %v357_v13 = vpop.f32.mrf.mxu0  ;;  %v1762_v17 = vpop.f32.mrf.mxu1 }
  0xd3   :  { %668 = vst [vmem:[#allocation2 + $0x10] sm:$0xff] %v357_v13  ;;  %v927_v15 = vadd.f32 %v926_v11, %v357_v13  ;;  %v997_v16 = vmul.f32 %v357_v13, %v357_v13  ;;  %701 = vst [vmem:[#allocation2 + $0x118] sm:$0xff] %v1762_v17 }
  0xd4   :  { %v1315_v18 = vpop.f32.mrf.mxu0  ;;  %v1765_v22 = vpop.f32.mrf.mxu1 }
  0xd5   :  { %v1060_v20 = vadd.f32 %v1059_v14, %v997_v16  ;;  %671 = vst [vmem:[#allocation2 + $0x28] sm:$0xff] %v1315_v18  ;;  %v928_v21 = vadd.f32 %v1312_v9, %v927_v15  ;;  %700 = vst [vmem:[#allocation2 + $0x110] sm:$0xff] %v1765_v22  ;;  %v1000_v29 = vmul.f32 %v1315_v18, %v1315_v18 }
  0xd6   :  { %v367_v23 = vpop.f32.mrf.mxu0  ;;  %v1768_v27 = vpop.f32.mrf.mxu1 }
  0xd7   :  { %670 = vst [vmem:[#allocation2 + $0x20] sm:$0xff] %v367_v23  ;;  %v929_v24 = vadd.f32 %v928_v21, %v367_v23  ;;  %v999_v25 = vmul.f32 %v367_v23, %v367_v23  ;;  %v1061_v26 = vadd.f32 %v1060_v20, %v998_v19  ;;  %703 = vst [vmem:[#allocation2 + $0x128] sm:$0xff] %v1768_v27 }
  0xd8   :  { %v1318_v28 = vpop.f32.mrf.mxu0  ;;  %v1771_v32 = vpop.f32.mrf.mxu1 }
  0xd9   :  { %v1062_v30 = vadd.f32 %v1061_v26, %v999_v25  ;;  %673 = vst [vmem:[#allocation2 + $0x38] sm:$0xff] %v1318_v28  ;;  %v930_v31 = vadd.f32 %v1315_v18, %v929_v24  ;;  %702 = vst [vmem:[#allocation2 + $0x120] sm:$0xff] %v1771_v32  ;;  %v1002_v39 = vmul.f32 %v1318_v28, %v1318_v28 }
  0xda   :  { %v377_v33 = vpop.f32.mrf.mxu0  ;;  %v1774_v37 = vpop.f32.mrf.mxu1 }
  0xdb   :  { %672 = vst [vmem:[#allocation2 + $0x30] sm:$0xff] %v377_v33  ;;  %v931_v34 = vadd.f32 %v930_v31, %v377_v33  ;;  %v1001_v35 = vmul.f32 %v377_v33, %v377_v33  ;;  %v1063_v36 = vadd.f32 %v1062_v30, %v1000_v29  ;;  %705 = vst [vmem:[#allocation2 + $0x138] sm:$0xff] %v1774_v37 }
  0xdc   :  { %v1321_v38 = vpop.f32.mrf.mxu0  ;;  %v1777_v42 = vpop.f32.mrf.mxu1 }
  0xdd   :  { %v1064_v40 = vadd.f32 %v1063_v36, %v1001_v35  ;;  %675 = vst [vmem:[#allocation2 + $0x48] sm:$0xff] %v1321_v38  ;;  %v932_v41 = vadd.f32 %v1318_v28, %v931_v34  ;;  %704 = vst [vmem:[#allocation2 + $0x130] sm:$0xff] %v1777_v42  ;;  %v1004_v49 = vmul.f32 %v1321_v38, %v1321_v38 }
  0xde   :  { %v387_v43 = vpop.f32.mrf.mxu0  ;;  %v1780_v47 = vpop.f32.mrf.mxu1 }
  0xdf   :  { %674 = vst [vmem:[#allocation2 + $0x40] sm:$0xff] %v387_v43  ;;  %v933_v44 = vadd.f32 %v932_v41, %v387_v43  ;;  %v1003_v45 = vmul.f32 %v387_v43, %v387_v43  ;;  %v1065_v46 = vadd.f32 %v1064_v40, %v1002_v39  ;;  %707 = vst [vmem:[#allocation2 + $0x148] sm:$0xff] %v1780_v47 }
  0xe0   :  { %v1324_v48 = vpop.f32.mrf.mxu0  ;;  %v1783_v52 = vpop.f32.mrf.mxu1 }
  0xe1   :  { %v1066_v50 = vadd.f32 %v1065_v46, %v1003_v45  ;;  %677 = vst [vmem:[#allocation2 + $0x58] sm:$0xff] %v1324_v48  ;;  %v934_v51 = vadd.f32 %v1321_v38, %v933_v44  ;;  %706 = vst [vmem:[#allocation2 + $0x140] sm:$0xff] %v1783_v52  ;;  %v1006_v59 = vmul.f32 %v1324_v48, %v1324_v48 }
  0xe2   :  { %v397_v53 = vpop.f32.mrf.mxu0  ;;  %v1786_v57 = vpop.f32.mrf.mxu1 }
  0xe3   :  { %676 = vst [vmem:[#allocation2 + $0x50] sm:$0xff] %v397_v53  ;;  %v935_v54 = vadd.f32 %v934_v51, %v397_v53  ;;  %v1005_v55 = vmul.f32 %v397_v53, %v397_v53  ;;  %v1067_v56 = vadd.f32 %v1066_v50, %v1004_v49  ;;  %709 = vst [vmem:[#allocation2 + $0x158] sm:$0xff] %v1786_v57 }
  0xe4   :  { %v1327_v58 = vpop.f32.mrf.mxu0  ;;  %v1789_v62 = vpop.f32.mrf.mxu1 }
  0xe5   :  { %v1068_v60 = vadd.f32 %v1067_v56, %v1005_v55  ;;  %679 = vst [vmem:[#allocation2 + $0x68] sm:$0xff] %v1327_v58  ;;  %v936_v61 = vadd.f32 %v1324_v48, %v935_v54  ;;  %708 = vst [vmem:[#allocation2 + $0x150] sm:$0xff] %v1789_v62  ;;  %v1008_v5 = vmul.f32 %v1327_v58, %v1327_v58 }
  0xe6   :  { %v407_v63 = vpop.f32.mrf.mxu0  ;;  %v1792_v3 = vpop.f32.mrf.mxu1 }
  0xe7   :  { %678 = vst [vmem:[#allocation2 + $0x60] sm:$0xff] %v407_v63  ;;  %v937_v0 = vadd.f32 %v936_v61, %v407_v63  ;;  %v1007_v1 = vmul.f32 %v407_v63, %v407_v63  ;;  %v1069_v2 = vadd.f32 %v1068_v60, %v1006_v59  ;;  %711 = vst [vmem:[#allocation2 + $0x168] sm:$0xff] %v1792_v3 }
  0xe8   :  { %v1330_v4 = vpop.f32.mrf.mxu0  ;;  %v1795_v9 = vpop.f32.mrf.mxu1 }
  0xe9   :  { %v1070_v6 = vadd.f32 %v1069_v2, %v1007_v1  ;;  %681 = vst [vmem:[#allocation2 + $0x78] sm:$0xff] %v1330_v4  ;;  %v938_v7 = vadd.f32 %v1327_v58, %v937_v0  ;;  %710 = vst [vmem:[#allocation2 + $0x160] sm:$0xff] %v1795_v9  ;;  %v1010_v18 = vmul.f32 %v1330_v4, %v1330_v4 }
  0xea   :  { %v417_v10 = vpop.f32.mrf.mxu0  ;;  %v1798_v15 = vpop.f32.mrf.mxu1 }
  0xeb   :  { %680 = vst [vmem:[#allocation2 + $0x70] sm:$0xff] %v417_v10  ;;  %v939_v11 = vadd.f32 %v938_v7, %v417_v10  ;;  %v1009_v13 = vmul.f32 %v417_v10, %v417_v10  ;;  %v1071_v14 = vadd.f32 %v1070_v6, %v1008_v5  ;;  %713 = vst [vmem:[#allocation2 + $0x178] sm:$0xff] %v1798_v15 }
  0xec   :  { %v1333_v16 = vpop.f32.mrf.mxu0  ;;  %v1801_v21 = vpop.f32.mrf.mxu1 }
  0xed   :  { %v1072_v19 = vadd.f32 %v1071_v14, %v1009_v13  ;;  %683 = vst [vmem:[#allocation2 + $0x88] sm:$0xff] %v1333_v16  ;;  %v940_v20 = vadd.f32 %v1330_v4, %v939_v11  ;;  %712 = vst [vmem:[#allocation2 + $0x170] sm:$0xff] %v1801_v21  ;;  %v1012_v30 = vmul.f32 %v1333_v16, %v1333_v16 }
  0xee   :  { %v427_v23 = vpop.f32.mrf.mxu0  ;;  %v1804_v28 = vpop.f32.mrf.mxu1 }
  0xef   :  { %682 = vst [vmem:[#allocation2 + $0x80] sm:$0xff] %v427_v23  ;;  %v941_v24 = vadd.f32 %v940_v20, %v427_v23  ;;  %v1011_v25 = vmul.f32 %v427_v23, %v427_v23  ;;  %v1073_v26 = vadd.f32 %v1072_v19, %v1010_v18  ;;  %715 = vst [vmem:[#allocation2 + $0x188] sm:$0xff] %v1804_v28 }
  0xf0   :  { %v1336_v29 = vpop.f32.mrf.mxu0  ;;  %v1807_v34 = vpop.f32.mrf.mxu1 }
  0xf1   :  { %v1074_v31 = vadd.f32 %v1073_v26, %v1011_v25  ;;  %685 = vst [vmem:[#allocation2 + $0x98] sm:$0xff] %v1336_v29  ;;  %v942_v33 = vadd.f32 %v1333_v16, %v941_v24  ;;  %714 = vst [vmem:[#allocation2 + $0x180] sm:$0xff] %v1807_v34  ;;  %v1014_v43 = vmul.f32 %v1336_v29, %v1336_v29 }
  0xf2   :  { %v437_v35 = vpop.f32.mrf.mxu0  ;;  %v1810_v40 = vpop.f32.mrf.mxu1 }
  0xf3   :  { %684 = vst [vmem:[#allocation2 + $0x90] sm:$0xff] %v437_v35  ;;  %v943_v36 = vadd.f32 %v942_v33, %v437_v35  ;;  %v1013_v38 = vmul.f32 %v437_v35, %v437_v35  ;;  %v1075_v39 = vadd.f32 %v1074_v31, %v1012_v30  ;;  %717 = vst [vmem:[#allocation2 + $0x198] sm:$0xff] %v1810_v40 }
  0xf4   :  { %v1339_v41 = vpop.f32.mrf.mxu0  ;;  %v1813_v46 = vpop.f32.mrf.mxu1 }
  0xf5   :  { %v1076_v44 = vadd.f32 %v1075_v39, %v1013_v38  ;;  %687 = vst [vmem:[#allocation2 + $0xa8] sm:$0xff] %v1339_v41  ;;  %v944_v45 = vadd.f32 %v1336_v29, %v943_v36  ;;  %716 = vst [vmem:[#allocation2 + $0x190] sm:$0xff] %v1813_v46  ;;  %v1016_v55 = vmul.f32 %v1339_v41, %v1339_v41 }
  0xf6   :  { %v447_v48 = vpop.f32.mrf.mxu0  ;;  %v1816_v53 = vpop.f32.mrf.mxu1 }
  0xf7   :  { %686 = vst [vmem:[#allocation2 + $0xa0] sm:$0xff] %v447_v48  ;;  %v945_v49 = vadd.f32 %v944_v45, %v447_v48  ;;  %v1015_v50 = vmul.f32 %v447_v48, %v447_v48  ;;  %v1077_v51 = vadd.f32 %v1076_v44, %v1014_v43  ;;  %719 = vst [vmem:[#allocation2 + $0x1a8] sm:$0xff] %v1816_v53 }
  0xf8   :  { %v1342_v54 = vpop.f32.mrf.mxu0  ;;  %v1819_v59 = vpop.f32.mrf.mxu1 }
  0xf9   :  { %v1078_v56 = vadd.f32 %v1077_v51, %v1015_v50  ;;  %689 = vst [vmem:[#allocation2 + $0xb8] sm:$0xff] %v1342_v54  ;;  %v946_v58 = vadd.f32 %v1339_v41, %v945_v49  ;;  %718 = vst [vmem:[#allocation2 + $0x1a0] sm:$0xff] %v1819_v59  ;;  %v1018_v4 = vmul.f32 %v1342_v54, %v1342_v54 }
  0xfa   :  { %v457_v60 = vpop.f32.mrf.mxu0  ;;  %v1822_v1 = vpop.f32.mrf.mxu1 }
  0xfb   :  { %688 = vst [vmem:[#allocation2 + $0xb0] sm:$0xff] %v457_v60  ;;  %v947_v61 = vadd.f32 %v946_v58, %v457_v60  ;;  %v1017_v63 = vmul.f32 %v457_v60, %v457_v60  ;;  %v1079_v0 = vadd.f32 %v1078_v56, %v1016_v55  ;;  %721 = vst [vmem:[#allocation2 + $0x1b8] sm:$0xff] %v1822_v1 }
  0xfc   :  { %v1345_v2 = vpop.f32.mrf.mxu0  ;;  %v1825_v7 = vpop.f32.mrf.mxu1 }
  0xfd   :  { %v1080_v5 = vadd.f32 %v1079_v0, %v1017_v63  ;;  %691 = vst [vmem:[#allocation2 + $0xc8] sm:$0xff] %v1345_v2  ;;  %v948_v6 = vadd.f32 %v1342_v54, %v947_v61  ;;  %720 = vst [vmem:[#allocation2 + $0x1b0] sm:$0xff] %v1825_v7  ;;  %v1020_v19 = vmul.f32 %v1345_v2, %v1345_v2 }
  0xfe   :  { %v467_v10 = vpop.f32.mrf.mxu0  ;;  %v1828_v16 = vpop.f32.mrf.mxu1 }
  0xff   :  { %690 = vst [vmem:[#allocation2 + $0xc0] sm:$0xff] %v467_v10  ;;  %v949_v11 = vadd.f32 %v948_v6, %v467_v10  ;;  %v1019_v13 = vmul.f32 %v467_v10, %v467_v10  ;;  %v1081_v14 = vadd.f32 %v1080_v5, %v1018_v4  ;;  %723 = vst [vmem:[#allocation2 + $0x1c8] sm:$0xff] %v1828_v16 }
 0x100   :  { %v1348_v18 = vpop.f32.mrf.mxu0  ;;  %v1831_v24 = vpop.f32.mrf.mxu1 }
 0x101   :  { %v1082_v20 = vadd.f32 %v1081_v14, %v1019_v13  ;;  %693 = vst [vmem:[#allocation2 + $0xd8] sm:$0xff] %v1348_v18  ;;  %v950_v23 = vadd.f32 %v1345_v2, %v949_v11  ;;  %722 = vst [vmem:[#allocation2 + $0x1c0] sm:$0xff] %v1831_v24  ;;  %v1022_v35 = vmul.f32 %v1348_v18, %v1348_v18 }
 0x102   :  { %v477_v25 = vpop.f32.mrf.mxu0  ;;  %v1834_v31 = vpop.f32.mrf.mxu1  ;;  %v1027_v11 = vmul.f32 %v1759_v12, %v1759_v12 }
 0x103   :  { %692 = vst [vmem:[#allocation2 + $0xd0] sm:$0xff] %v477_v25  ;;  %v951_v26 = vadd.f32 %v950_v23, %v477_v25  ;;  %v1021_v29 = vmul.f32 %v477_v25, %v477_v25  ;;  %v1083_v30 = vadd.f32 %v1082_v20, %v1020_v19  ;;  %725 = vst [vmem:[#allocation2 + $0x1d8] sm:$0xff] %v1834_v31 }
 0x104   :  { %v1351_v33 = vpop.f32.mrf.mxu0  ;;  %v1837_v39 = vpop.f32.mrf.mxu1 }
 0x105   :  { %v1084_v36 = vadd.f32 %v1083_v30, %v1021_v29  ;;  %695 = vst [vmem:[#allocation2 + $0xe8] sm:$0xff] %v1351_v33  ;;  %v952_v38 = vadd.f32 %v1348_v18, %v951_v26  ;;  %724 = vst [vmem:[#allocation2 + $0x1d0] sm:$0xff] %v1837_v39  ;;  %v1024_v50 = vmul.f32 %v1351_v33, %v1351_v33 }
 0x106   :  { %v487_v41 = vpop.f32.mrf.mxu0  ;;  %v1840_v48 = vpop.f32.mrf.mxu1 }
 0x107   :  { %694 = vst [vmem:[#allocation2 + $0xe0] sm:$0xff] %v487_v41  ;;  %v953_v43 = vadd.f32 %v952_v38, %v487_v41  ;;  %v1023_v44 = vmul.f32 %v487_v41, %v487_v41  ;;  %v1085_v45 = vadd.f32 %v1084_v36, %v1022_v35  ;;  %727 = vst [vmem:[#allocation2 + $0x1e8] sm:$0xff] %v1840_v48 }
 0x108   :  { %v1354_v49 = vpop.f32.mrf.mxu0  ;;  %v1843_v55 = vpop.f32.mrf.mxu1 }
 0x109   :  { %v1086_v51 = vadd.f32 %v1085_v45, %v1023_v44  ;;  %697 = vst [vmem:[#allocation2 + $0xf8] sm:$0xff] %v1354_v49  ;;  %v954_v54 = vadd.f32 %v1351_v33, %v953_v43  ;;  %726 = vst [vmem:[#allocation2 + $0x1e0] sm:$0xff] %v1843_v55  ;;  %v1026_v0 = vmul.f32 %v1354_v49, %v1354_v49 }
 0x10a   :  { %v497_v56 = vpop.f32.mrf.mxu0  ;;  %v1846_v63 = vpop.f32.mrf.mxu1 }
 0x10b   :  { %696 = vst [vmem:[#allocation2 + $0xf0] sm:$0xff] %v497_v56  ;;  %v955_v58 = vadd.f32 %v954_v54, %v497_v56  ;;  %v1025_v60 = vmul.f32 %v497_v56, %v497_v56  ;;  %v1087_v61 = vadd.f32 %v1086_v51, %v1024_v50  ;;  %729 = vst [vmem:[#allocation2 + $0x1f8] sm:$0xff] %v1846_v63 }
 0x10c   :  { %v1849_v5 = vpop.f32.mrf.mxu1 }
 0x10d   :  { %v956_v2 = vadd.f32 %v1354_v49, %v955_v58  ;;  %v1088_v4 = vadd.f32 %v1087_v61, %v1025_v60  ;;  %728 = vst [vmem:[#allocation2 + $0x1f0] sm:$0xff] %v1849_v5 }
 0x10f   :  { %v1089_v6 = vadd.f32 %v1088_v4, %v1026_v0  ;;  %v957_v10 = vadd.f32 %v956_v2, %v1759_v12 }
 0x110   :  { %1428 = shalt.err (!%p1425_p4)
}
 0x111   :  { %s1462_s12 = smov 128   ;;  %s1463_s13 = smov 8   ;;  %v1028_v13 = vmul.f32 %v1756_v8, %v1756_v8  ;;  %v1090_v14 = vadd.f32 %v1089_v6, %v1027_v11  ;;  %v958_v18 = vadd.f32 %v1756_v8, %v957_v10  ;;  %v1029_v19 = vmul.f32 %v1765_v22, %v1765_v22 }
 0x112   :  { %1144 = dma.vmem_to_hbm [thread:$0]  %s1139_s10, 8192, %s1956_s2, [#allocation3], %s1462_s12, %s1462_s12, %s1463_s13   ;;  %v1030_v23 = vmul.f32 %v1762_v17, %v1762_v17  ;;  %v1031_v30 = vmul.f32 %v1771_v32, %v1771_v32  ;;  %v1032_v8 = vmul.f32 %v1768_v27, %v1768_v27  ;;  %v1033_v38 = vmul.f32 %v1777_v42, %v1777_v42 }
 0x113   :  { %v959_v12 = vadd.f32 %v958_v18, %v1765_v22  ;;  %v1091_v20 = vadd.f32 %v1090_v14, %v1028_v13  ;;  %v1035_v45 = vmul.f32 %v1783_v52, %v1783_v52  ;;  %v1037_v54 = vmul.f32 %v1789_v62, %v1789_v62  ;;  %s1464_s2 = smov [#allocation4]  }
 0x114   :  { %v1039_v61 = vmul.f32 %v1795_v9, %v1795_v9  ;;  %v1041_v6 = vmul.f32 %v1801_v21, %v1801_v21  ;;  %v1043_v14 = vmul.f32 %v1807_v34, %v1807_v34  ;;  %s1151_s16 = sshll.u32 %s1464_s2, 4  ;;  %s1152_s16 = int_to_ptr.vmem [resolvable:$true] %s1151_s16 }
 0x115   :  { %v1092_v25 = vadd.f32 %v1091_v20, %v1029_v19  ;;  %v960_v26 = vadd.f32 %v1762_v17, %v959_v12  ;;  %v1034_v17 = vmul.f32 %v1774_v37, %v1774_v37  ;;  %v1045_v20 = vmul.f32 %v1813_v46, %v1813_v46  ;;  %s1437_s17 = scalar_lea.vmem %s1152_s16, 128  ;;  %p1442_p6 = scmp.lt.s32.totalorder %s1152_s16, %s1152_s16 }
 0x116   :  { %p1438_p5 = scmp.ne.s32.totalorder %s1152_s16, %s1437_s17  ;;  %p1443_p7 = scmp.lt.s32.totalorder %s1437_s17, %s1437_s17 }
 0x117   :  { %v961_v29 = vadd.f32 %v960_v26, %v1771_v32  ;;  %v1093_v33 = vadd.f32 %v1092_v25, %v1030_v23 }
 0x118   :  { %p1444_p8 = por %p1443_p7, %p1442_p6 }
 0x119   :  { %v1094_v35 = vadd.f32 %v1093_v33, %v1031_v30  ;;  %v962_v36 = vadd.f32 %v1768_v27, %v961_v29  ;;  %v1036_v27 = vmul.f32 %v1780_v47, %v1780_v47  ;;  %v1047_v29 = vmul.f32 %v1819_v59, %v1819_v59 }
 0x11a   :  { %p1445_p9 = pnand %p1444_p8, %p1438_p5 }
 0x11b   :  { %v963_v22 = vadd.f32 %v962_v36, %v1777_v42  ;;  %v1095_v41 = vadd.f32 %v1094_v35, %v1032_v8  ;;  %v1049_v35 = vmul.f32 %v1825_v7, %v1825_v7 }
 0x11d   :  { %v1096_v43 = vadd.f32 %v1095_v41, %v1033_v38  ;;  %v964_v44 = vadd.f32 %v1774_v37, %v963_v22  ;;  %v1038_v37 = vmul.f32 %v1786_v57, %v1786_v57  ;;  %v1051_v41 = vmul.f32 %v1831_v24, %v1831_v24 }
 0x11f   :  { %v965_v32 = vadd.f32 %v964_v44, %v1783_v52  ;;  %v1097_v49 = vadd.f32 %v1096_v43, %v1034_v17 }
 0x121   :  { %v1098_v50 = vadd.f32 %v1097_v49, %v1035_v45  ;;  %v966_v51 = vadd.f32 %v1780_v47, %v965_v32  ;;  %v1040_v47 = vmul.f32 %v1792_v3, %v1792_v3  ;;  %v1053_v32 = vmul.f32 %v1837_v39, %v1837_v39 }
 0x123   :  { %v967_v42 = vadd.f32 %v966_v51, %v1789_v62  ;;  %v1099_v56 = vadd.f32 %v1098_v50, %v1036_v27  ;;  %v1055_v50 = vmul.f32 %v1843_v55, %v1843_v55 }
 0x125   :  { %v1100_v58 = vadd.f32 %v1099_v56, %v1037_v54  ;;  %v968_v60 = vadd.f32 %v1786_v57, %v967_v42  ;;  %v1042_v57 = vmul.f32 %v1798_v15, %v1798_v15  ;;  %v1057_v56 = vmul.f32 %v1849_v5, %v1849_v5 }
 0x127   :  { %v969_v52 = vadd.f32 %v968_v60, %v1795_v9  ;;  %v1101_v0 = vadd.f32 %v1100_v58, %v1038_v37 }
 0x129   :  { %v1102_v2 = vadd.f32 %v1101_v0, %v1039_v61  ;;  %v970_v4 = vadd.f32 %v1792_v3, %v969_v52  ;;  %v1044_v3 = vmul.f32 %v1804_v28, %v1804_v28 }
 0x12b   :  { %v971_v62 = vadd.f32 %v970_v4, %v1801_v21  ;;  %v1103_v10 = vadd.f32 %v1102_v2, %v1040_v47  ;;  %v730_v47 = vlaneseq }
 0x12d   :  { %v1104_v11 = vadd.f32 %v1103_v10, %v1041_v6  ;;  %v972_v13 = vadd.f32 %v1798_v15, %v971_v62  ;;  %v1046_v15 = vmul.f32 %v1810_v40, %v1810_v40  ;;  %v731_v6 = vshrl.u32 %v730_v47, 7 }
 0x12f   :  { %v973_v9 = vadd.f32 %v972_v13, %v1807_v34  ;;  %v1105_v18 = vadd.f32 %v1104_v11, %v1042_v57  ;;  %vm1129_vm2 = vcmp.eq.s32.totalorder %v731_v6, 1  ;;  %vm1128_vm3 = vcmp.eq.s32.totalorder %v731_v6, 0 }
 0x131   :  { %v1106_v12 = vadd.f32 %v1105_v18, %v1043_v14  ;;  %v974_v19 = vadd.f32 %v1804_v28, %v973_v9  ;;  %v1048_v28 = vmul.f32 %v1816_v53, %v1816_v53 }
 0x133   :  { %v975_v21 = vadd.f32 %v974_v19, %v1813_v46  ;;  %v1107_v23 = vadd.f32 %v1106_v12, %v1044_v3 }
 0x135   :  { %v1108_v25 = vadd.f32 %v1107_v23, %v1045_v20  ;;  %v976_v26 = vadd.f32 %v1810_v40, %v975_v21  ;;  %v1050_v40 = vmul.f32 %v1822_v1, %v1822_v1 }
 0x137   :  { %v977_v34 = vadd.f32 %v976_v26, %v1819_v59  ;;  %v1109_v30 = vadd.f32 %v1108_v25, %v1046_v15 }
 0x139   :  { %v1110_v33 = vadd.f32 %v1109_v30, %v1047_v29  ;;  %v978_v8 = vadd.f32 %v1816_v53, %v977_v34  ;;  %v1052_v53 = vmul.f32 %v1828_v16, %v1828_v16 }
 0x13b   :  { %v979_v46 = vadd.f32 %v978_v8, %v1825_v7  ;;  %v1111_v36 = vadd.f32 %v1110_v33, %v1048_v28 }
 0x13d   :  { %v1112_v22 = vadd.f32 %v1111_v36, %v1049_v35  ;;  %v980_v38 = vadd.f32 %v1822_v1, %v979_v46  ;;  %v1054_v1 = vmul.f32 %v1834_v31, %v1834_v31 }
 0x13f   :  { %v981_v59 = vadd.f32 %v980_v38, %v1831_v24  ;;  %v1113_v17 = vadd.f32 %v1112_v22, %v1050_v40 }
 0x141   :  { %v1114_v43 = vadd.f32 %v1113_v17, %v1051_v41  ;;  %v982_v44 = vadd.f32 %v1828_v16, %v981_v59  ;;  %v1056_v16 = vmul.f32 %v1840_v48, %v1840_v48 }
 0x143   :  { %v983_v7 = vadd.f32 %v982_v44, %v1837_v39  ;;  %v1115_v45 = vadd.f32 %v1114_v43, %v1052_v53 }
 0x145   :  { %v1116_v49 = vadd.f32 %v1115_v45, %v1053_v32  ;;  %v984_v27 = vadd.f32 %v1834_v31, %v983_v7  ;;  %v1058_v31 = vmul.f32 %v1846_v63, %v1846_v63 }
 0x147   :  { %v985_v24 = vadd.f32 %v984_v27, %v1843_v55  ;;  %v1117_v51 = vadd.f32 %v1116_v49, %v1054_v1 }
 0x149   :  { %v1118_v42 = vadd.f32 %v1117_v51, %v1055_v50  ;;  %v986_v54 = vadd.f32 %v1840_v48, %v985_v24 }
 0x14b   :  { %v987_v39 = vadd.f32 %v986_v54, %v1849_v5  ;;  %v1119_v37 = vadd.f32 %v1118_v42, %v1056_v16 }
 0x14d   :  { %v988_v58 = vadd.f32 %v1846_v63, %v987_v39  ;;  %v1120_v60 = vadd.f32 %v1119_v37, %v1057_v56 }
 0x14f   :  { %v989_v55 = vrot.slane %v988_v58, 4  ;;  %v1121_v52 = vadd.f32 %v1120_v60, %v1058_v31 }
 0x151   :  { %v990_v61 = vadd.f32 %v989_v55, %v988_v58  ;;  %v1122_v0 = vrot.slane %v1121_v52, 4 }
 0x153   :  { %v991_v2 = vrot.slane %v990_v61, 2  ;;  %v1123_v4 = vadd.f32 %v1122_v0, %v1121_v52 }
 0x155   :  { %v992_v48 = vadd.f32 %v991_v2, %v990_v61  ;;  %v1124_v62 = vrot.slane %v1123_v4, 2 }
 0x157   :  { %v1125_v10 = vadd.f32 %v1124_v62, %v1123_v4  ;;  %v993_v57 = vrot.slane %v992_v48, 1 }
 0x159   :  { %v1126_v5 = vrot.slane %v1125_v10, 1  ;;  %v994_v63 = vadd.f32 %v993_v57, %v992_v48 }
 0x15b   :  { %v1127_v11 = vadd.f32 %v1126_v5, %v1125_v10 }
 0x15d   :  { %v1130_v13 = vsel %vm1129_vm2, %v1127_v11, 0.0 }
 0x15e   :  { %v1131_v9 = vsel %vm1128_vm3, %v994_v63, %v1130_v13 }
 0x15f   :  { %1132 = vst [vmem:[#allocation4] sm:$0xff] %v1131_v9 }
 0x160   :  { %1448 = shalt.err (!%p1445_p9)
}
 0x161   :  { %1154 = dma.vmem_to_hbm [thread:$0]  %s1152_s16, 128, %s1957_s3, [#allocation5]  }
 0x162   :  { %1457 = dma.done.wait [#allocation3], 8192  }
 0x163   :  { %1458 = vsyncadd [#allocation3], 4294959104 }
 0x164   :  { %1459 = dma.done.wait [#allocation5], 128  }
 0x165   :  { %1460 = vsyncadd [#allocation5], 4294967168 }
 0x166   :  { %1161 = vsyncpa [#allocation3], 1 }
 0x167   :  { %1162 = vsyncpa [#allocation5], 1 }

</bundles_post_ra>
